<compile_context>
chip_gen: v6e
topology: v6e:2x2x1
jax: 0.10.0
libtpu: 0.0.40
codegen_flags: <defaults>
</compile_context>

<pallas_src>
import functools

import jax
import jax.numpy as jnp
import numpy as np
from jax import lax
from jax.experimental import pallas as pl
from jax.experimental.pallas import tpu as pltpu

# Hyperparameters from the PyTorch module __init__ defaults.
TEMPERATURE = 0.07
HARD_POSITIVE_WEIGHT = 1.5
HARD_NEGATIVE_WEIGHT = 2.0
SIM_THR_POS = 0.5
SIM_THR_NEG = 0.3
NEGATIVE_LOSS_WEIGHT = 0.3

# Folded constants: one multiply per weight instead of two, reciprocal-multiplies
# instead of VALU divides.
INV_TEMPERATURE = 1.0 / TEMPERATURE
C_POS = (HARD_POSITIVE_WEIGHT - 1.0) / SIM_THR_POS            # hard-positive slope
C_NEG = (HARD_NEGATIVE_WEIGHT - 1.0) / (1.0 - SIM_THR_NEG)    # hard-negative slope

LANE = 128


def _round_up(x, m):
    return (x + m - 1) // m * m


def _vmem_limit_bytes():
    """Generation-aware VMEM budget: ~112 MiB on v5e/v6e, ~52 MiB on v7x."""
    try:
        cap = int(pltpu.get_tpu_info().vmem_capacity_bytes)
        return int(min(max(cap - 12 * (1 << 20), 32 * (1 << 20)), 112 * (1 << 20)))
    except Exception:
        return 64 * (1 << 20)


def _w2ml_row_tile_kernel(q_ref, ct_ref, rid_ref, lab_c_ref, cid_ref, lab_r_ref,
                          out_ref, *, use_const_rowmax):
    # --- similarity slab on the MXU -----------------------------------------------
    # Features are pre-normalized and the contrast operand pre-transposed in the
    # wrapper, so there is no per-tile normalization or XLU transpose here.
    sim = lax.dot_general(q_ref[...], ct_ref[...], (((1,), (0,)), ((), ())),
                          preferred_element_type=jnp.float32)        # (tq, Bc) f32

    adc = sim * INV_TEMPERATURE
    if use_const_rowmax:
        # Row max of a cosine-similarity matrix is the self-similarity diagonal (== 1),
        # so the shift is the compile-time constant 1/T (saves an XLU row-max per slab).
        logits = adc - INV_TEMPERATURE
    else:
        logits = adc - jnp.max(adc, axis=1, keepdims=True)

    # --- validity / positive masks (precomputed ids, kept boolean) -----------------
    rid = rid_ref[...]          # (tq, 1) global row ids, -1 on padded rows
    cid = cid_ref[...]          # (1, Bc) global col ids, -1 on padded cols
    lab_c = lab_c_ref[...]      # (tq, 1)
    lab_r = lab_r_ref[...]      # (1, Bc)

    valid = (cid != rid) & (cid >= 0) & (rid >= 0)                   # (tq, Bc) bool
    is_pos = lab_c == lab_r

    # --- W2ML hard-sample weights (max(diff,0) folds the threshold compare) --------
    pos_w = 1.0 + jnp.maximum(SIM_THR_POS - sim, 0.0) * C_POS
    neg_w = 1.0 + jnp.maximum(sim - SIM_THR_NEG, 0.0) * C_NEG
    wpm = jnp.where(valid & is_pos, pos_w, 0.0)                      # weighted pos mask
    wnm = jnp.where(valid & jnp.logical_not(is_pos), neg_w, 0.0)     # weighted neg mask

    # --- masked softmax denominator (only place exp is needed) ---------------------
    exp_logits = jnp.where(valid, jnp.exp(logits), 0.0)
    log_denom = jnp.log(jnp.maximum(
        jnp.sum(exp_logits, axis=1, keepdims=True), 1e-30))          # (tq, 1)

    # --- positive part: sum(log_prob*wpm) = sum(logits*wpm) - log_denom*sum(wpm) ---
    wpm_sum = jnp.sum(wpm, axis=1, keepdims=True)
    lw_pos = jnp.sum(logits * wpm, axis=1, keepdims=True)
    has_p = wpm_sum > 0.0
    inv_p = pl.reciprocal(jnp.where(has_p, wpm_sum, 1.0), approx=False)
    row_pos = jnp.where(has_p, lw_pos * inv_p - log_denom, 0.0)

    # --- negative part (weight applied twice, matching the reference) --------------
    wnm_sum = jnp.sum(wnm, axis=1, keepdims=True)
    lw_neg = jnp.sum(logits * wnm * wnm, axis=1, keepdims=True)
    has_n = wnm_sum > 0.0
    inv_n = pl.reciprocal(jnp.where(has_n, wnm_sum, 1.0), approx=False)
    row_neg = jnp.where(has_n, lw_neg * inv_n, 0.0)

    # --- single packed per-row output block -> one writeback DMA per grid step -----
    out_ref[:, 0:1] = row_pos
    out_ref[:, 1:2] = has_p.astype(jnp.float32)
    out_ref[:, 2:3] = row_neg
    out_ref[:, 3:4] = has_n.astype(jnp.float32)


def w2ml_supcon_loss(features, labels, *, row_tile=None, matmul_dtype=jnp.float32):
    """features: [B, D] or [B, 1, D]; labels: [B] int. Returns the scalar loss.

    matmul_dtype=jnp.bfloat16 halves the resident-operand VMEM/DMA footprint and
    uses the fast MXU path on v6e/v7x (recommended for large B, D); float32 keeps
    tight agreement with the PyTorch f32 semantics.
    """
    if features.ndim == 3:
        if features.shape[1] != 1:
            raise ValueError("n_views > 1 is not supported")  # TODO(synk): multi-view
        features = features.reshape(features.shape[0], features.shape[2])
    features = features.astype(jnp.float32)
    labels = labels.astype(jnp.int32)
    b, d = features.shape

    # Normalize ONCE in the wrapper (reference: F.normalize, eps=1e-12).
    feats_n = features / jnp.maximum(
        jnp.linalg.norm(features, axis=1, keepdims=True), 1e-12)

    if row_tile is None:
        row_tile = min(256, _round_up(b, 8))   # 256-row LHS fills the v6e/v7x MXU
    assert row_tile % 8 == 0, "row_tile must be a multiple of 8 (sublane)"
    tq = row_tile
    b_pad_r = _round_up(b, tq)                 # query-row padding (multiple of tile)
    b_pad_c = _round_up(b, LANE)               # contrast-column padding (decoupled)
    d_pad = _round_up(d, LANE)
    num_tiles = b_pad_r // tq

    mm_dtype = jnp.dtype(matmul_dtype)
    # Constant row-max is exact only with f32 similarities (see review caveat re bf16).
    use_const_rowmax = mm_dtype == jnp.dtype(jnp.float32)

    # Pad lane-dense; operands stored in the matmul dtype (no in-kernel casts).
    feat_rows = jnp.zeros((b_pad_r, d_pad), mm_dtype).at[:b, :d].set(
        feats_n.astype(mm_dtype))
    feat_t = jnp.zeros((d_pad, b_pad_c), mm_dtype).at[:d, :b].set(
        feats_n.T.astype(mm_dtype))                       # transpose ONCE in the wrapper
    row_ids = jnp.full((b_pad_r, 1), -1, jnp.int32).at[:b, 0].set(
        jnp.arange(b, dtype=jnp.int32))
    lab_col = jnp.full((b_pad_r, 1), -1, jnp.int32).at[:b, 0].set(labels)
    col_ids = jnp.full((1, b_pad_c), -1, jnp.int32).at[0, :b].set(
        jnp.arange(b, dtype=jnp.int32))
    lab_row = jnp.full((1, b_pad_c), -1, jnp.int32).at[0, :b].set(labels)

    kernel = functools.partial(_w2ml_row_tile_kernel, use_const_rowmax=use_const_rowmax)
    out_shape = jax.ShapeDtypeStruct((b_pad_r, 4), jnp.float32)
    out_spec = pl.BlockSpec((tq, 4), lambda i: (i, 0))
    q_spec = pl.BlockSpec((tq, d_pad), lambda i: (i, 0))
    rid_spec = pl.BlockSpec((tq, 1), lambda i: (i, 0))
    labc_spec = pl.BlockSpec((tq, 1), lambda i: (i, 0))

    def resident_spec(shape, single_buffer):
        # Constant-index (grid-resident) operand; request ONE VMEM buffer instead of
        # the default double buffering so the operand only costs its own footprint.
        if single_buffer:
            return pl.BlockSpec(shape, lambda i: (0, 0), pipeline_mode=pl.Buffered(1))
        return pl.BlockSpec(shape, lambda i: (0, 0))

    def invoke(single_buffer):
        ct_spec = resident_spec((d_pad, b_pad_c), single_buffer)
        cid_spec = resident_spec((1, b_pad_c), single_buffer)
        labr_spec = resident_spec((1, b_pad_c), single_buffer)
        return pl.pallas_call(
            kernel,
            out_shape=out_shape,
            grid_spec=pltpu.PrefetchScalarGridSpec(
                num_scalar_prefetch=0,
                grid=(num_tiles,),
                in_specs=[q_spec, ct_spec, rid_spec, labc_spec, cid_spec, labr_spec],
                out_specs=out_spec,
            ),
            compiler_params=pltpu.CompilerParams(
                dimension_semantics=("parallel",),   # independent row tiles (v7x megacore)
                vmem_limit_bytes=_vmem_limit_bytes(),
            ),
        )(feat_rows, feat_t, row_ids, lab_col, col_ids, lab_row)

    try:
        packed = jax.block_until_ready(invoke(True))
    except Exception:
        # pipeline_mode=pl.Buffered not supported by this JAX build; fall back to the
        # default (double-buffered) resident operand.
        packed = invoke(False)

    # Tiny final combine (padded rows contribute exact zeros).
    cp = jnp.sum(packed[:, 1])
    cn = jnp.sum(packed[:, 3])
    pos_loss = -jnp.sum(packed[:, 0]) / jnp.maximum(cp, 1.0)
    neg_loss = jnp.sum(packed[:, 2]) / jnp.maximum(cn, 1.0)
    return pos_loss + NEGATIVE_LOSS_WEIGHT * neg_loss


def _jax_reference(features, labels):
    """Pure-JAX re-implementation of the PyTorch forward (for verification)."""
    x = features.astype(jnp.float32)
    if x.ndim == 3:
        x = x.reshape(x.shape[0] * x.shape[1], x.shape[2])
    B = x.shape[0]
    xn = x / jnp.maximum(jnp.linalg.norm(x, axis=1, keepdims=True), 1e-12)
    sim = xn @ xn.T
    adc = sim / TEMPERATURE
    logits = adc - jnp.max(adc, axis=1, keepdims=True)
    mask = (labels[:, None] == labels[None, :]).astype(jnp.float32)
    logits_mask = 1.0 - jnp.eye(B, dtype=jnp.float32)
    off = logits_mask > 0
    hard_p = off & (mask > 0) & (sim < SIM_THR_POS)
    pos_w = jnp.where(hard_p, 1.0 + (SIM_THR_POS - sim) / SIM_THR_POS *
                      (HARD_POSITIVE_WEIGHT - 1.0), 1.0)
    hard_n = off & (mask == 0) & (sim > SIM_THR_NEG)
    neg_w = jnp.where(hard_n, 1.0 + (sim - SIM_THR_NEG) / (1.0 - SIM_THR_NEG) *
                      (HARD_NEGATIVE_WEIGHT - 1.0), 1.0)
    wpm = mask * logits_mask * pos_w
    log_prob = logits - jnp.log(jnp.sum(jnp.exp(logits) * logits_mask, axis=1,
                                        keepdims=True))
    wpm_s = wpm.sum(1)
    vp = wpm_s > 0
    row_p = (log_prob * wpm).sum(1) / jnp.where(vp, wpm_s, 1.0)
    cnt_p = vp.sum()
    pos_loss = -jnp.where(vp, row_p, 0.0).sum() / jnp.maximum(cnt_p, 1)
    wnm = (1.0 - mask) * logits_mask * neg_w
    wnm_s = wnm.sum(1)
    vn = wnm_s > 0
    row_n = (logits * wnm * wnm).sum(1) / jnp.where(vn, wnm_s, 1.0)
    cnt_n = vn.sum()
    neg_loss = jnp.where(vn, row_n, 0.0).sum() / jnp.maximum(cnt_n, 1)
    return pos_loss + NEGATIVE_LOSS_WEIGHT * neg_loss


if __name__ == "__main__":
    key = jax.random.PRNGKey(0)
    kf, kl = jax.random.split(key)

    # Case 1: toy [B, D] input (module forward with 2-D features), f32 matmul path.
    B, D = 8, 32
    features = jax.random.normal(kf, (B, D), dtype=jnp.float32)
    labels = jax.random.randint(kl, (B,), 0, 3, dtype=jnp.int32)
    loss = w2ml_supcon_loss(features, labels)
    jax.block_until_ready(loss)
    ref = _jax_reference(features, labels)
    np.testing.assert_allclose(np.asarray(loss), np.asarray(ref), rtol=1e-4, atol=1e-4)

    # Case 2: [B, n_views=1, D] with odd sizes -> padding, decoupled row/col padding,
    # multi-tile grid.
    kf2, kl2 = jax.random.split(kl)
    B2, D2 = 13, 96
    features2 = jax.random.normal(kf2, (B2, 1, D2), dtype=jnp.float32)
    labels2 = jax.random.randint(kl2, (B2,), 0, 4, dtype=jnp.int32)
    loss2 = w2ml_supcon_loss(features2, labels2, row_tile=8)
    jax.block_until_ready(loss2)
    ref2 = _jax_reference(features2, labels2)
    np.testing.assert_allclose(np.asarray(loss2), np.asarray(ref2), rtol=1e-4, atol=1e-4)

    # Case 3: bf16 matmul operands (recommended on v6e/v7x for large shapes) — smoke test
    # with a coarse bound (threshold comparisons use bf16-rounded similarities).
    loss_bf16 = w2ml_supcon_loss(features, labels, matmul_dtype=jnp.bfloat16)
    jax.block_until_ready(loss_bf16)
    assert bool(jnp.isfinite(loss_bf16)) and abs(float(loss_bf16) - float(ref)) < 0.5

    print("KERNEL_OK")
</pallas_src>

<mosaic_0001>
module attributes {stable_mosaic.version = 11 : i64} {
  func.func @_w2ml_row_tile_kernel(%arg0: i32, %arg1: memref<8x128xf32, #tpu.memory_space<vmem>>, %arg2: memref<128x128xf32, #tpu.memory_space<vmem>>, %arg3: memref<8x1xi32, #tpu.memory_space<vmem>>, %arg4: memref<8x1xi32, #tpu.memory_space<vmem>>, %arg5: memref<1x128xi32, #tpu.memory_space<vmem>>, %arg6: memref<1x128xi32, #tpu.memory_space<vmem>>, %arg7: memref<8x4xf32, #tpu.memory_space<vmem>>) attributes {dimension_semantics = [#tpu.dimension_semantics<parallel>], iteration_bounds = array<i64: 1>, scalar_prefetch = 0 : i64, scratch_operands = 0 : i64, tpu.core_type = #tpu.core_type<tc>, window_params = [{transform_indices = @transform_0, window_bounds = array<i64: 8, 128>}, {pipeline_mode = #tpu.pipeline_mode<synchronous>, transform_indices = @transform_1, window_bounds = array<i64: 128, 128>}, {transform_indices = @transform_2, window_bounds = array<i64: 8, 1>}, {transform_indices = @transform_3, window_bounds = array<i64: 8, 1>}, {pipeline_mode = #tpu.pipeline_mode<synchronous>, transform_indices = @transform_4, window_bounds = array<i64: 1, 128>}, {pipeline_mode = #tpu.pipeline_mode<synchronous>, transform_indices = @transform_5, window_bounds = array<i64: 1, 128>}, {transform_indices = @transform_6, window_bounds = array<i64: 8, 4>}]} {
    %c0 = arith.constant 0 : index
    %c0_0 = arith.constant 0 : index
    %0 = vector.load %arg1[%c0, %c0_0] : memref<8x128xf32, #tpu.memory_space<vmem>>, vector<8x128xf32>
    %c0_1 = arith.constant 0 : index
    %c0_2 = arith.constant 0 : index
    %1 = vector.load %arg2[%c0_1, %c0_2] : memref<128x128xf32, #tpu.memory_space<vmem>>, vector<128x128xf32>
    %cst = arith.constant dense<0.000000e+00> : vector<8x128xf32>
    %2 = tpu.matmul %0, %1, %cst {dimension_numbers = #tpu.dot_dimension_numbers<[1], [0], [0], [1], [0, 0, 1, 1], [], []>} : vector<8x128xf32>, vector<128x128xf32>, vector<8x128xf32> -> vector<8x128xf32>
    %cst_3 = arith.constant 14.2857141 : f32
    %3 = vector.broadcast %cst_3 : f32 to vector<8x128xf32>
    %4 = arith.mulf %2, %3 : vector<8x128xf32>
    %cst_4 = arith.constant 14.2857141 : f32
    %5 = vector.broadcast %cst_4 : f32 to vector<8x128xf32>
    %6 = arith.subf %4, %5 : vector<8x128xf32>
    %c0_5 = arith.constant 0 : index
    %c0_6 = arith.constant 0 : index
    %7 = vector.load %arg3[%c0_5, %c0_6] : memref<8x1xi32, #tpu.memory_space<vmem>>, vector<8x1xi32>
    %c0_7 = arith.constant 0 : index
    %c0_8 = arith.constant 0 : index
    %8 = vector.load %arg5[%c0_7, %c0_8] : memref<1x128xi32, #tpu.memory_space<vmem>>, vector<1x128xi32>
    %c0_9 = arith.constant 0 : index
    %c0_10 = arith.constant 0 : index
    %9 = vector.load %arg4[%c0_9, %c0_10] : memref<8x1xi32, #tpu.memory_space<vmem>>, vector<8x1xi32>
    %c0_11 = arith.constant 0 : index
    %c0_12 = arith.constant 0 : index
    %10 = vector.load %arg6[%c0_11, %c0_12] : memref<1x128xi32, #tpu.memory_space<vmem>>, vector<1x128xi32>
    %11 = vector.broadcast %8 : vector<1x128xi32> to vector<8x128xi32>
    %12 = vector.broadcast %7 : vector<8x1xi32> to vector<8x128xi32>
    %13 = arith.cmpi ne, %11, %12 : vector<8x128xi32>
    %c0_i32 = arith.constant 0 : i32
    %14 = vector.broadcast %c0_i32 : i32 to vector<1x128xi32>
    %15 = arith.cmpi sge, %8, %14 : vector<1x128xi32>
    %16 = vector.broadcast %15 : vector<1x128xi1> to vector<8x128xi1>
    %17 = arith.andi %13, %16 : vector<8x128xi1>
    %c0_i32_13 = arith.constant 0 : i32
    %18 = vector.broadcast %c0_i32_13 : i32 to vector<8x1xi32>
    %19 = arith.cmpi sge, %7, %18 : vector<8x1xi32>
    %20 = vector.broadcast %19 : vector<8x1xi1> to vector<8x128xi1>
    %21 = arith.andi %17, %20 : vector<8x128xi1>
    %22 = vector.broadcast %9 : vector<8x1xi32> to vector<8x128xi32>
    %23 = vector.broadcast %10 : vector<1x128xi32> to vector<8x128xi32>
    %24 = arith.cmpi eq, %22, %23 : vector<8x128xi32>
    %cst_14 = arith.constant 5.000000e-01 : f32
    %25 = vector.broadcast %cst_14 : f32 to vector<8x128xf32>
    %26 = arith.subf %25, %2 : vector<8x128xf32>
    %cst_15 = arith.constant 0.000000e+00 : f32
    %27 = vector.broadcast %cst_15 : f32 to vector<8x128xf32>
    %28 = arith.maximumf %26, %27 : vector<8x128xf32>
    %cst_16 = arith.constant 1.000000e+00 : f32
    %29 = vector.broadcast %cst_16 : f32 to vector<8x128xf32>
    %30 = arith.mulf %28, %29 : vector<8x128xf32>
    %cst_17 = arith.constant 1.000000e+00 : f32
    %31 = vector.broadcast %cst_17 : f32 to vector<8x128xf32>
    %32 = arith.addf %31, %30 : vector<8x128xf32>
    %cst_18 = arith.constant 3.000000e-01 : f32
    %33 = vector.broadcast %cst_18 : f32 to vector<8x128xf32>
    %34 = arith.subf %2, %33 : vector<8x128xf32>
    %cst_19 = arith.constant 0.000000e+00 : f32
    %35 = vector.broadcast %cst_19 : f32 to vector<8x128xf32>
    %36 = arith.maximumf %34, %35 : vector<8x128xf32>
    %cst_20 = arith.constant 1.42857146 : f32
    %37 = vector.broadcast %cst_20 : f32 to vector<8x128xf32>
    %38 = arith.mulf %36, %37 : vector<8x128xf32>
    %cst_21 = arith.constant 1.000000e+00 : f32
    %39 = vector.broadcast %cst_21 : f32 to vector<8x128xf32>
    %40 = arith.addf %39, %38 : vector<8x128xf32>
    %41 = arith.andi %21, %24 : vector<8x128xi1>
    %cst_22 = arith.constant 0.000000e+00 : f32
    %42 = vector.broadcast %cst_22 : f32 to vector<8x128xf32>
    %43 = arith.select %41, %32, %42 : vector<8x128xi1>, vector<8x128xf32>
    %cst_23 = arith.constant dense<true> : vector<8x128xi1>
    %44 = arith.xori %24, %cst_23 : vector<8x128xi1>
    %45 = arith.andi %21, %44 : vector<8x128xi1>
    %cst_24 = arith.constant 0.000000e+00 : f32
    %46 = vector.broadcast %cst_24 : f32 to vector<8x128xf32>
    %47 = arith.select %45, %40, %46 : vector<8x128xi1>, vector<8x128xf32>
    %48 = math.exp %6 : vector<8x128xf32>
    %cst_25 = arith.constant 0.000000e+00 : f32
    %49 = vector.broadcast %cst_25 : f32 to vector<8x128xf32>
    %50 = arith.select %21, %48, %49 : vector<8x128xi1>, vector<8x128xf32>
    %cst_26 = arith.constant dense<0.000000e+00> : vector<8xf32>
    %51 = vector.multi_reduction <add>, %50, %cst_26 [1] : vector<8x128xf32> to vector<8xf32>
    %52 = vector.shape_cast %51 : vector<8xf32> to vector<8x1xf32>
    %cst_27 = arith.constant 1.000000e-30 : f32
    %53 = vector.broadcast %cst_27 : f32 to vector<8x1xf32>
    %54 = arith.maximumf %52, %53 : vector<8x1xf32>
    %55 = math.log %54 : vector<8x1xf32>
    %cst_28 = arith.constant dense<0.000000e+00> : vector<8xf32>
    %56 = vector.multi_reduction <add>, %43, %cst_28 [1] : vector<8x128xf32> to vector<8xf32>
    %57 = vector.shape_cast %56 : vector<8xf32> to vector<8x1xf32>
    %58 = arith.mulf %6, %43 : vector<8x128xf32>
    %cst_29 = arith.constant dense<0.000000e+00> : vector<8xf32>
    %59 = vector.multi_reduction <add>, %58, %cst_29 [1] : vector<8x128xf32> to vector<8xf32>
    %60 = vector.shape_cast %59 : vector<8xf32> to vector<8x1xf32>
    %cst_30 = arith.constant 0.000000e+00 : f32
    %61 = vector.broadcast %cst_30 : f32 to vector<8x1xf32>
    %62 = arith.cmpf ogt, %57, %61 : vector<8x1xf32>
    %cst_31 = arith.constant 1.000000e+00 : f32
    %63 = vector.broadcast %cst_31 : f32 to vector<8x1xf32>
    %64 = arith.select %62, %57, %63 : vector<8x1xi1>, vector<8x1xf32>
    %65 = tpu.reciprocal %64 : vector<8x1xf32> -> vector<8x1xf32>
    %66 = arith.mulf %60, %65 : vector<8x1xf32>
    %67 = arith.subf %66, %55 : vector<8x1xf32>
    %cst_32 = arith.constant 0.000000e+00 : f32
    %68 = vector.broadcast %cst_32 : f32 to vector<8x1xf32>
    %69 = arith.select %62, %67, %68 : vector<8x1xi1>, vector<8x1xf32>
    %cst_33 = arith.constant dense<0.000000e+00> : vector<8xf32>
    %70 = vector.multi_reduction <add>, %47, %cst_33 [1] : vector<8x128xf32> to vector<8xf32>
    %71 = vector.shape_cast %70 : vector<8xf32> to vector<8x1xf32>
    %72 = arith.mulf %6, %47 : vector<8x128xf32>
    %73 = arith.mulf %72, %47 : vector<8x128xf32>
    %cst_34 = arith.constant dense<0.000000e+00> : vector<8xf32>
    %74 = vector.multi_reduction <add>, %73, %cst_34 [1] : vector<8x128xf32> to vector<8xf32>
    %75 = vector.shape_cast %74 : vector<8xf32> to vector<8x1xf32>
    %cst_35 = arith.constant 0.000000e+00 : f32
    %76 = vector.broadcast %cst_35 : f32 to vector<8x1xf32>
    %77 = arith.cmpf ogt, %71, %76 : vector<8x1xf32>
    %cst_36 = arith.constant 1.000000e+00 : f32
    %78 = vector.broadcast %cst_36 : f32 to vector<8x1xf32>
    %79 = arith.select %77, %71, %78 : vector<8x1xi1>, vector<8x1xf32>
    %80 = tpu.reciprocal %79 : vector<8x1xf32> -> vector<8x1xf32>
    %81 = arith.mulf %75, %80 : vector<8x1xf32>
    %cst_37 = arith.constant 0.000000e+00 : f32
    %82 = vector.broadcast %cst_37 : f32 to vector<8x1xf32>
    %83 = arith.select %77, %81, %82 : vector<8x1xi1>, vector<8x1xf32>
    %c0_38 = arith.constant 0 : index
    %c0_39 = arith.constant 0 : index
    %84 = vector.load %arg7[%c0_38, %c0_39] : memref<8x4xf32, #tpu.memory_space<vmem>>, vector<8x1xf32>
    tpu.vector_store %arg7[%c0_38, %c0_39], %69 {strides = array<i32>} : memref<8x4xf32, #tpu.memory_space<vmem>>, vector<8x1xf32>,
    %85 = arith.extui %62 : vector<8x1xi1> to vector<8x1xi32>
    %86 = arith.sitofp %85 : vector<8x1xi32> to vector<8x1xf32>
    %c0_40 = arith.constant 0 : index
    %c1 = arith.constant 1 : index
    %87 = vector.load %arg7[%c0_40, %c1] : memref<8x4xf32, #tpu.memory_space<vmem>>, vector<8x1xf32>
    tpu.vector_store %arg7[%c0_40, %c1], %86 {strides = array<i32>} : memref<8x4xf32, #tpu.memory_space<vmem>>, vector<8x1xf32>,
    %c0_41 = arith.constant 0 : index
    %c2 = arith.constant 2 : index
    %88 = vector.load %arg7[%c0_41, %c2] : memref<8x4xf32, #tpu.memory_space<vmem>>, vector<8x1xf32>
    tpu.vector_store %arg7[%c0_41, %c2], %83 {strides = array<i32>} : memref<8x4xf32, #tpu.memory_space<vmem>>, vector<8x1xf32>,
    %89 = arith.extui %77 : vector<8x1xi1> to vector<8x1xi32>
    %90 = arith.sitofp %89 : vector<8x1xi32> to vector<8x1xf32>
    %c0_42 = arith.constant 0 : index
    %c3 = arith.constant 3 : index
    %91 = vector.load %arg7[%c0_42, %c3] : memref<8x4xf32, #tpu.memory_space<vmem>>, vector<8x1xf32>
    tpu.vector_store %arg7[%c0_42, %c3], %90 {strides = array<i32>} : memref<8x4xf32, #tpu.memory_space<vmem>>, vector<8x1xf32>,
    return
  }
  func.func @transform_0(%arg0: i32) -> (i32, i32) {
    %c0_i32 = arith.constant 0 : i32
    %c0_i32_0 = arith.constant 0 : i32
    return %arg0, %c0_i32 : i32, i32
  }
  func.func @transform_1(%arg0: i32) -> (i32, i32) {
    %c0_i32 = arith.constant 0 : i32
    %c0_i32_0 = arith.constant 0 : i32
    %c0_i32_1 = arith.constant 0 : i32
    return %c0_i32, %c0_i32_0 : i32, i32
  }
  func.func @transform_2(%arg0: i32) -> (i32, i32) {
    %c0_i32 = arith.constant 0 : i32
    %c0_i32_0 = arith.constant 0 : i32
    return %arg0, %c0_i32 : i32, i32
  }
  func.func @transform_3(%arg0: i32) -> (i32, i32) {
    %c0_i32 = arith.constant 0 : i32
    %c0_i32_0 = arith.constant 0 : i32
    return %arg0, %c0_i32 : i32, i32
  }
  func.func @transform_4(%arg0: i32) -> (i32, i32) {
    %c0_i32 = arith.constant 0 : i32
    %c0_i32_0 = arith.constant 0 : i32
    %c0_i32_1 = arith.constant 0 : i32
    return %c0_i32, %c0_i32_0 : i32, i32
  }
  func.func @transform_5(%arg0: i32) -> (i32, i32) {
    %c0_i32 = arith.constant 0 : i32
    %c0_i32_0 = arith.constant 0 : i32
    %c0_i32_1 = arith.constant 0 : i32
    return %c0_i32, %c0_i32_0 : i32, i32
  }
  func.func @transform_6(%arg0: i32) -> (i32, i32) {
    %c0_i32 = arith.constant 0 : i32
    %c0_i32_0 = arith.constant 0 : i32
    return %arg0, %c0_i32 : i32, i32
  }
}

module attributes {stable_mosaic.version = 11 : i64} {
  func.func @_w2ml_row_tile_kernel(%arg0: i32, %arg1: memref<8x128xf32, #tpu.memory_space<vmem>>, %arg2: memref<128x128xf32, #tpu.memory_space<vmem>>, %arg3: memref<8x1xi32, #tpu.memory_space<vmem>>, %arg4: memref<8x1xi32, #tpu.memory_space<vmem>>, %arg5: memref<1x128xi32, #tpu.memory_space<vmem>>, %arg6: memref<1x128xi32, #tpu.memory_space<vmem>>, %arg7: memref<8x4xf32, #tpu.memory_space<vmem>>) attributes {dimension_semantics = [#tpu.dimension_semantics<parallel>], iteration_bounds = array<i64: 1>, scalar_prefetch = 0 : i64, scratch_operands = 0 : i64, tpu.core_type = #tpu.core_type<tc>, window_params = [{transform_indices = @transform_0, window_bounds = array<i64: 8, 128>}, {pipeline_mode = #tpu.pipeline_mode<synchronous>, transform_indices = @transform_1, window_bounds = array<i64: 128, 128>}, {transform_indices = @transform_2, window_bounds = array<i64: 8, 1>}, {transform_indices = @transform_3, window_bounds = array<i64: 8, 1>}, {pipeline_mode = #tpu.pipeline_mode<synchronous>, transform_indices = @transform_4, window_bounds = array<i64: 1, 128>}, {pipeline_mode = #tpu.pipeline_mode<synchronous>, transform_indices = @transform_5, window_bounds = array<i64: 1, 128>}, {transform_indices = @transform_6, window_bounds = array<i64: 8, 4>}]} {
    %c0 = arith.constant 0 : index
    %c0_0 = arith.constant 0 : index
    %0 = vector.load %arg1[%c0, %c0_0] : memref<8x128xf32, #tpu.memory_space<vmem>>, vector<8x128xf32>
    %c0_1 = arith.constant 0 : index
    %c0_2 = arith.constant 0 : index
    %1 = vector.load %arg2[%c0_1, %c0_2] : memref<128x128xf32, #tpu.memory_space<vmem>>, vector<128x128xf32>
    %cst = arith.constant dense<0.000000e+00> : vector<8x128xf32>
    %2 = tpu.matmul %0, %1, %cst {dimension_numbers = #tpu.dot_dimension_numbers<[1], [0], [0], [1], [0, 0, 1, 1], [], []>} : vector<8x128xf32>, vector<128x128xf32>, vector<8x128xf32> -> vector<8x128xf32>
    %cst_3 = arith.constant 14.2857141 : f32
    %3 = vector.broadcast %cst_3 : f32 to vector<8x128xf32>
    %4 = arith.mulf %2, %3 : vector<8x128xf32>
    %cst_4 = arith.constant 14.2857141 : f32
    %5 = vector.broadcast %cst_4 : f32 to vector<8x128xf32>
    %6 = arith.subf %4, %5 : vector<8x128xf32>
    %c0_5 = arith.constant 0 : index
    %c0_6 = arith.constant 0 : index
    %7 = vector.load %arg3[%c0_5, %c0_6] : memref<8x1xi32, #tpu.memory_space<vmem>>, vector<8x1xi32>
    %c0_7 = arith.constant 0 : index
    %c0_8 = arith.constant 0 : index
    %8 = vector.load %arg5[%c0_7, %c0_8] : memref<1x128xi32, #tpu.memory_space<vmem>>, vector<1x128xi32>
    %c0_9 = arith.constant 0 : index
    %c0_10 = arith.constant 0 : index
    %9 = vector.load %arg4[%c0_9, %c0_10] : memref<8x1xi32, #tpu.memory_space<vmem>>, vector<8x1xi32>
    %c0_11 = arith.constant 0 : index
    %c0_12 = arith.constant 0 : index
    %10 = vector.load %arg6[%c0_11, %c0_12] : memref<1x128xi32, #tpu.memory_space<vmem>>, vector<1x128xi32>
    %11 = vector.broadcast %8 : vector<1x128xi32> to vector<8x128xi32>
    %12 = vector.broadcast %7 : vector<8x1xi32> to vector<8x128xi32>
    %13 = arith.cmpi ne, %11, %12 : vector<8x128xi32>
    %c0_i32 = arith.constant 0 : i32
    %14 = vector.broadcast %c0_i32 : i32 to vector<1x128xi32>
    %15 = arith.cmpi sge, %8, %14 : vector<1x128xi32>
    %16 = vector.broadcast %15 : vector<1x128xi1> to vector<8x128xi1>
    %17 = arith.andi %13, %16 : vector<8x128xi1>
    %c0_i32_13 = arith.constant 0 : i32
    %18 = vector.broadcast %c0_i32_13 : i32 to vector<8x1xi32>
    %19 = arith.cmpi sge, %7, %18 : vector<8x1xi32>
    %20 = vector.broadcast %19 : vector<8x1xi1> to vector<8x128xi1>
    %21 = arith.andi %17, %20 : vector<8x128xi1>
    %22 = vector.broadcast %9 : vector<8x1xi32> to vector<8x128xi32>
    %23 = vector.broadcast %10 : vector<1x128xi32> to vector<8x128xi32>
    %24 = arith.cmpi eq, %22, %23 : vector<8x128xi32>
    %cst_14 = arith.constant 5.000000e-01 : f32
    %25 = vector.broadcast %cst_14 : f32 to vector<8x128xf32>
    %26 = arith.subf %25, %2 : vector<8x128xf32>
    %cst_15 = arith.constant 0.000000e+00 : f32
    %27 = vector.broadcast %cst_15 : f32 to vector<8x128xf32>
    %28 = arith.maximumf %26, %27 : vector<8x128xf32>
    %cst_16 = arith.constant 1.000000e+00 : f32
    %29 = vector.broadcast %cst_16 : f32 to vector<8x128xf32>
    %30 = arith.mulf %28, %29 : vector<8x128xf32>
    %cst_17 = arith.constant 1.000000e+00 : f32
    %31 = vector.broadcast %cst_17 : f32 to vector<8x128xf32>
    %32 = arith.addf %31, %30 : vector<8x128xf32>
    %cst_18 = arith.constant 3.000000e-01 : f32
    %33 = vector.broadcast %cst_18 : f32 to vector<8x128xf32>
    %34 = arith.subf %2, %33 : vector<8x128xf32>
    %cst_19 = arith.constant 0.000000e+00 : f32
    %35 = vector.broadcast %cst_19 : f32 to vector<8x128xf32>
    %36 = arith.maximumf %34, %35 : vector<8x128xf32>
    %cst_20 = arith.constant 1.42857146 : f32
    %37 = vector.broadcast %cst_20 : f32 to vector<8x128xf32>
    %38 = arith.mulf %36, %37 : vector<8x128xf32>
    %cst_21 = arith.constant 1.000000e+00 : f32
    %39 = vector.broadcast %cst_21 : f32 to vector<8x128xf32>
    %40 = arith.addf %39, %38 : vector<8x128xf32>
    %41 = arith.andi %21, %24 : vector<8x128xi1>
    %cst_22 = arith.constant 0.000000e+00 : f32
    %42 = vector.broadcast %cst_22 : f32 to vector<8x128xf32>
    %43 = arith.select %41, %32, %42 : vector<8x128xi1>, vector<8x128xf32>
    %cst_23 = arith.constant dense<true> : vector<8x128xi1>
    %44 = arith.xori %24, %cst_23 : vector<8x128xi1>
    %45 = arith.andi %21, %44 : vector<8x128xi1>
    %cst_24 = arith.constant 0.000000e+00 : f32
    %46 = vector.broadcast %cst_24 : f32 to vector<8x128xf32>
    %47 = arith.select %45, %40, %46 : vector<8x128xi1>, vector<8x128xf32>
    %48 = math.exp %6 : vector<8x128xf32>
    %cst_25 = arith.constant 0.000000e+00 : f32
    %49 = vector.broadcast %cst_25 : f32 to vector<8x128xf32>
    %50 = arith.select %21, %48, %49 : vector<8x128xi1>, vector<8x128xf32>
    %cst_26 = arith.constant dense<0.000000e+00> : vector<8xf32>
    %51 = vector.multi_reduction <add>, %50, %cst_26 [1] : vector<8x128xf32> to vector<8xf32>
    %52 = vector.shape_cast %51 : vector<8xf32> to vector<8x1xf32>
    %cst_27 = arith.constant 1.000000e-30 : f32
    %53 = vector.broadcast %cst_27 : f32 to vector<8x1xf32>
    %54 = arith.maximumf %52, %53 : vector<8x1xf32>
    %55 = math.log %54 : vector<8x1xf32>
    %cst_28 = arith.constant dense<0.000000e+00> : vector<8xf32>
    %56 = vector.multi_reduction <add>, %43, %cst_28 [1] : vector<8x128xf32> to vector<8xf32>
    %57 = vector.shape_cast %56 : vector<8xf32> to vector<8x1xf32>
    %58 = arith.mulf %6, %43 : vector<8x128xf32>
    %cst_29 = arith.constant dense<0.000000e+00> : vector<8xf32>
    %59 = vector.multi_reduction <add>, %58, %cst_29 [1] : vector<8x128xf32> to vector<8xf32>
    %60 = vector.shape_cast %59 : vector<8xf32> to vector<8x1xf32>
    %cst_30 = arith.constant 0.000000e+00 : f32
    %61 = vector.broadcast %cst_30 : f32 to vector<8x1xf32>
    %62 = arith.cmpf ogt, %57, %61 : vector<8x1xf32>
    %cst_31 = arith.constant 1.000000e+00 : f32
    %63 = vector.broadcast %cst_31 : f32 to vector<8x1xf32>
    %64 = arith.select %62, %57, %63 : vector<8x1xi1>, vector<8x1xf32>
    %65 = tpu.reciprocal %64 : vector<8x1xf32> -> vector<8x1xf32>
    %66 = arith.mulf %60, %65 : vector<8x1xf32>
    %67 = arith.subf %66, %55 : vector<8x1xf32>
    %cst_32 = arith.constant 0.000000e+00 : f32
    %68 = vector.broadcast %cst_32 : f32 to vector<8x1xf32>
    %69 = arith.select %62, %67, %68 : vector<8x1xi1>, vector<8x1xf32>
    %cst_33 = arith.constant dense<0.000000e+00> : vector<8xf32>
    %70 = vector.multi_reduction <add>, %47, %cst_33 [1] : vector<8x128xf32> to vector<8xf32>
    %71 = vector.shape_cast %70 : vector<8xf32> to vector<8x1xf32>
    %72 = arith.mulf %6, %47 : vector<8x128xf32>
    %73 = arith.mulf %72, %47 : vector<8x128xf32>
    %cst_34 = arith.constant dense<0.000000e+00> : vector<8xf32>
    %74 = vector.multi_reduction <add>, %73, %cst_34 [1] : vector<8x128xf32> to vector<8xf32>
    %75 = vector.shape_cast %74 : vector<8xf32> to vector<8x1xf32>
    %cst_35 = arith.constant 0.000000e+00 : f32
    %76 = vector.broadcast %cst_35 : f32 to vector<8x1xf32>
    %77 = arith.cmpf ogt, %71, %76 : vector<8x1xf32>
    %cst_36 = arith.constant 1.000000e+00 : f32
    %78 = vector.broadcast %cst_36 : f32 to vector<8x1xf32>
    %79 = arith.select %77, %71, %78 : vector<8x1xi1>, vector<8x1xf32>
    %80 = tpu.reciprocal %79 : vector<8x1xf32> -> vector<8x1xf32>
    %81 = arith.mulf %75, %80 : vector<8x1xf32>
    %cst_37 = arith.constant 0.000000e+00 : f32
    %82 = vector.broadcast %cst_37 : f32 to vector<8x1xf32>
    %83 = arith.select %77, %81, %82 : vector<8x1xi1>, vector<8x1xf32>
    %c0_38 = arith.constant 0 : index
    %c0_39 = arith.constant 0 : index
    %84 = vector.load %arg7[%c0_38, %c0_39] : memref<8x4xf32, #tpu.memory_space<vmem>>, vector<8x1xf32>
    tpu.vector_store %arg7[%c0_38, %c0_39], %69 {strides = array<i32>} : memref<8x4xf32, #tpu.memory_space<vmem>>, vector<8x1xf32>,
    %85 = arith.extui %62 : vector<8x1xi1> to vector<8x1xi32>
    %86 = arith.sitofp %85 : vector<8x1xi32> to vector<8x1xf32>
    %c0_40 = arith.constant 0 : index
    %c1 = arith.constant 1 : index
    %87 = vector.load %arg7[%c0_40, %c1] : memref<8x4xf32, #tpu.memory_space<vmem>>, vector<8x1xf32>
    tpu.vector_store %arg7[%c0_40, %c1], %86 {strides = array<i32>} : memref<8x4xf32, #tpu.memory_space<vmem>>, vector<8x1xf32>,
    %c0_41 = arith.constant 0 : index
    %c2 = arith.constant 2 : index
    %88 = vector.load %arg7[%c0_41, %c2] : memref<8x4xf32, #tpu.memory_space<vmem>>, vector<8x1xf32>
    tpu.vector_store %arg7[%c0_41, %c2], %83 {strides = array<i32>} : memref<8x4xf32, #tpu.memory_space<vmem>>, vector<8x1xf32>,
    %89 = arith.extui %77 : vector<8x1xi1> to vector<8x1xi32>
    %90 = arith.sitofp %89 : vector<8x1xi32> to vector<8x1xf32>
    %c0_42 = arith.constant 0 : index
    %c3 = arith.constant 3 : index
    %91 = vector.load %arg7[%c0_42, %c3] : memref<8x4xf32, #tpu.memory_space<vmem>>, vector<8x1xf32>
    tpu.vector_store %arg7[%c0_42, %c3], %90 {strides = array<i32>} : memref<8x4xf32, #tpu.memory_space<vmem>>, vector<8x1xf32>,
    return
  }
  func.func @transform_0(%arg0: i32) -> (i32, i32) {
    %c0_i32 = arith.constant 0 : i32
    %c0_i32_0 = arith.constant 0 : i32
    return %arg0, %c0_i32 : i32, i32
  }
  func.func @transform_1(%arg0: i32) -> (i32, i32) {
    %c0_i32 = arith.constant 0 : i32
    %c0_i32_0 = arith.constant 0 : i32
    %c0_i32_1 = arith.constant 0 : i32
    return %c0_i32, %c0_i32_0 : i32, i32
  }
  func.func @transform_2(%arg0: i32) -> (i32, i32) {
    %c0_i32 = arith.constant 0 : i32
    %c0_i32_0 = arith.constant 0 : i32
    return %arg0, %c0_i32 : i32, i32
  }
  func.func @transform_3(%arg0: i32) -> (i32, i32) {
    %c0_i32 = arith.constant 0 : i32
    %c0_i32_0 = arith.constant 0 : i32
    return %arg0, %c0_i32 : i32, i32
  }
  func.func @transform_4(%arg0: i32) -> (i32, i32) {
    %c0_i32 = arith.constant 0 : i32
    %c0_i32_0 = arith.constant 0 : i32
    %c0_i32_1 = arith.constant 0 : i32
    return %c0_i32, %c0_i32_0 : i32, i32
  }
  func.func @transform_5(%arg0: i32) -> (i32, i32) {
    %c0_i32 = arith.constant 0 : i32
    %c0_i32_0 = arith.constant 0 : i32
    %c0_i32_1 = arith.constant 0 : i32
    return %c0_i32, %c0_i32_0 : i32, i32
  }
  func.func @transform_6(%arg0: i32) -> (i32, i32) {
    %c0_i32 = arith.constant 0 : i32
    %c0_i32_0 = arith.constant 0 : i32
    return %arg0, %c0_i32 : i32, i32
  }
}

</mosaic_0001>

<bundles_post_ra>
// kernel: tpu_custom_call.1
= control target key start
LH: loop header
LB: loop body
LE: loop exit
PB: predicated region body
PF: predicated region fallthrough
CT: control target
= control target key end

     0   :  { %11 = vsyncpa [#allocation3], 0  ;;  %s316_s21 = smov [#allocation2]   ;;  %s427_s0 = inlined_call_operand.vmem [shape: f32[8,128], index: 0, kind: input, shape index: {}]   ;;  %s428_s1 = inlined_call_operand.hbm [shape: f32[128,128], index: 1, kind: input, shape index: {}]   ;;  %s429_s2 = inlined_call_operand.vmem [shape: s32[8,1], index: 2, kind: input, shape index: {}]   ;;  %s430_s3 = inlined_call_operand.vmem [shape: s32[8,1], index: 3, kind: input, shape index: {}]   ;;  %s431_s4 = inlined_call_operand.vmem [shape: s32[1,128], index: 4, kind: input, shape index: {}]   ;;  %s432_s5 = inlined_call_operand.vmem [shape: s32[1,128], index: 5, kind: input, shape index: {}]   ;;  %s433_s6 = inlined_call_operand.vmem [shape: f32[8,4], index: 6, kind: output, shape index: {}]  }
   0x1   :  { %s19_s22 = sshll.u32 %s316_s21, 4  ;;  %s20_s22 = int_to_ptr.vmem [resolvable:$true] %s19_s22 }
   0x2   :  { %s302_s23 = scalar_lea.vmem %s20_s22, 2048  ;;  %p307_p1 = scmp.lt.s32.totalorder %s20_s22, %s20_s22 }
   0x3   :  { %p303_p0 = scmp.ne.s32.totalorder %s20_s22, %s302_s23  ;;  %p308_p2 = scmp.lt.s32.totalorder %s302_s23, %s302_s23 }
   0x5   :  { %p309_p3 = por %p308_p2, %p307_p1 }
   0x7   :  { %p310_p4 = pnand %p309_p3, %p303_p0 }
   0x9   :  { %313 = shalt.err (!%p310_p4)
}
   0xa   :  { %s317_s24 = smov 128   ;;  %s318_s25 = smov 8  }
   0xb   :  { %25 = dma.hbm_to_vmem [thread:$0]  %s428_s1, 2048, %s20_s22, [#allocation3], %s317_s24, %s317_s24, %s318_s25  }
   0xc   :  { %314 = dma.done.wait [#allocation3], 2048  }
   0xd   :  { %315 = vsyncadd [#allocation3], 4294965248  ;;  %v319_v0 = vmov 0.0   ;;  %vm320_vm0 = vmmov 0   ;;  %v321_v1 = vmov 0   ;;  %v53_v2 = vld [vmem:[#allocation2 + $0x78] sm:$0xff]  ;;  %v130_v22 = vlaneseq }
   0xe   :  { %242 = vmatprep.subr.mxu0 %v319_v0  ;;  %274 = vmatprep.mubr.msk.f32.mxu0 %vm320_vm0, %v319_v0  ;;  %v52_v3 = vld [vmem:[#allocation2 + $0x70] sm:$0xff]  ;;  %v51_v4 = vld [vmem:[#allocation2 + $0x68] sm:$0xff]  ;;  %v50_v5 = vld [vmem:[#allocation2 + $0x60] sm:$0xff]  ;;  %vm322_vm9 = vmmov 1   ;;  %vm203_vm15 = vcmask 7168   ;;  %vm207_vm0 = vcmask 15368  }
   0xf   :  { %284 = vset.pattern.permute.xlu0 %v321_v1  ;;  %285 = vset.pattern.permute.xlu1 %v321_v1  ;;  %v126_v6 = vld [vmem:[%s429_s2] sm:$0xff]  ;;  %v49_v7 = vld [vmem:[#allocation2 + $0x58] sm:$0xff]  ;;  %v48_v10 = vld [vmem:[#allocation2 + $0x50] sm:$0xff]  ;;  %v131_v24 = vshrl.u32 %v130_v22, 7 }
  0x10   :  { %243 = vmatpush3.msra.mxu0 %v53_v2  ;;  %135 = vperm.xlu0 %284, %v126_v6   ;;  %vm146_vm1 = vcmp.ge.s32.totalorder %v126_v6, 0  ;;  %v128_v8 = vld [vmem:[%s430_s3] sm:$0xff]  ;;  %v47_v11 = vld [vmem:[#allocation2 + $0x48] sm:$0xff]  ;;  %v45_v13 = vld [vmem:[#allocation2 + $0x38] sm:$0xff] }
  0x11   :  { %244 = vmatprep.subr.mxu0 %v319_v0  ;;  %v147_v9 = vsel %vm146_vm1, 1, %v321_v1  ;;  %154 = vperm.xlu1 %285, %v128_v8   ;;  %v46_v12 = vld [vmem:[#allocation2 + $0x40] sm:$0xff]  ;;  %v44_v14 = vld [vmem:[#allocation2 + $0x30] sm:$0xff]  ;;  %v43_v15 = vld [vmem:[#allocation2 + $0x28] sm:$0xff]  ;;  %v132_v25 = vsub.s32 0, %v131_v24  ;;  %vm209_vm1 = vcmask 23568  }
  0x12   :  { %245 = vmatpush3.msra.mxu0 %v52_v3  ;;  %v42_v16 = vld [vmem:[#allocation2 + $0x20] sm:$0xff]  ;;  %v41_v17 = vld [vmem:[#allocation2 + $0x18] sm:$0xff]  ;;  %v40_v18 = vld [vmem:[#allocation2 + $0x10] sm:$0xff] }
  0x13   :  { %246 = vmatprep.subr.mxu0 %v319_v0  ;;  %v39_v19 = vld [vmem:[#allocation2 + $0x8] sm:$0xff]  ;;  %v38_v20 = vld [vmem:[#allocation2] sm:$0xff] }
  0x14   :  { %247 = vmatpush3.msra.mxu0 %v51_v4  ;;  %149 = vperm.xlu0 %284, %v147_v9   ;;  %v37_v21 = vld [vmem:[%s427_s0] sm:$0xff] }
  0x15   :  { %248 = vmatprep.subr.mxu0 %v319_v0  ;;  %v127_v23 = vld [vmem:[%s431_s4] sm:$0x1] }
  0x16   :  { %249 = vmatpush3.msra.mxu0 %v50_v5  ;;  %vm138_vm2 = vcmp.ge.s32.totalorder %v127_v23, 0  ;;  %v133_v28 = vrot.slane %v127_v23, %v132_v25  ;;  %v221_v31 = vld [vmem:[%s432_s5] ss:$0 sm:$0xff] }
  0x17   :  { %250 = vmatprep.subr.mxu0 %v319_v0  ;;  %v139_v26 = vsel %vm138_vm2, 1, %v321_v1  ;;  %vm213_vm2 = vcmask 31768  }
  0x18   :  { %251 = vmatpush3.msra.mxu0 %v49_v7  ;;  %v143_v29 = vrot.slane %v139_v26, %v132_v25 }
  0x19   :  { %252 = vmatprep.subr.mxu0 %v319_v0 }
  0x1a   :  { %253 = vmatpush3.msra.mxu0 %v48_v10  ;;  %vm144_vm3 = vcmp.eq.s32.totalorder %v143_v29, 1 }
  0x1b   :  { %254 = vmatprep.subr.mxu0 %v319_v0 }
  0x1c   :  { %255 = vmatpush3.msra.mxu0 %v47_v11 }
  0x1d   :  { %256 = vmatprep.subr.mxu0 %v319_v0 }
  0x1e   :  { %257 = vmatpush3.msra.mxu0 %v46_v12 }
  0x1f   :  { %258 = vmatprep.subr.mxu0 %v319_v0 }
  0x20   :  { %259 = vmatpush3.msra.mxu0 %v45_v13 }
  0x21   :  { %260 = vmatprep.subr.mxu0 %v319_v0 }
  0x22   :  { %261 = vmatpush3.msra.mxu0 %v44_v14 }
  0x23   :  { %262 = vmatprep.subr.mxu0 %v319_v0 }
  0x24   :  { %263 = vmatpush3.msra.mxu0 %v43_v15 }
  0x25   :  { %264 = vmatprep.subr.mxu0 %v319_v0 }
  0x26   :  { %265 = vmatpush3.msra.mxu0 %v42_v16 }
  0x27   :  { %266 = vmatprep.subr.mxu0 %v319_v0 }
  0x28   :  { %267 = vmatpush3.msra.mxu0 %v41_v17 }
  0x29   :  { %268 = vmatprep.subr.mxu0 %v319_v0 }
  0x2a   :  { %269 = vmatpush3.msra.mxu0 %v40_v18 }
  0x2b   :  { %270 = vmatprep.subr.mxu0 %v319_v0 }
  0x2c   :  { %271 = vmatpush3.msra.mxu0 %v39_v19 }
  0x2d   :  { %272 = vmatprep.subr.mxu0 %v319_v0 }
  0x2e   :  { %273 = vmatpush3.msra.mxu0 %v38_v20 }
  0x2f   :  { %275 = vmatmul.mubr.f32.vlgmr.msra.gmra.mxu0 %v37_v21 }
  0x8b   :  { %v136_v27 = vpop.permute.xlu0 %135 }
  0x8c   :  { %vm137_vm4 = vcmp.ne.s32.totalorder %v133_v28, %v136_v27  ;;  %v155_v32 = vpop.permute.xlu1 %154 }
  0x8d   :  { %vm145_vm5 = vmand %vm137_vm4, %vm144_vm3  ;;  %vm160_vm7 = vcmp.eq.s32.totalorder %v155_v32, %v221_v31 }
  0x8e   :  { %vm170_vm10 = vmxor %vm160_vm7, %vm322_vm9 }
  0x8f   :  { %v150_v30 = vpop.permute.xlu0 %149 }
  0x90   :  { %vm151_vm6 = vcmp.eq.s32.totalorder %v150_v30, 1 }
  0x91   :  { %vm397_vm8 = vmand %vm145_vm5, %vm151_vm6 }
  0x92   :  { %vm168_vm11 = vmand %vm397_vm8, %vm160_vm7 }
  0x93   :  { %vm171_vm12 = vmand %vm397_vm8, %vm170_vm10 }
  0xef   :  { %v120_v33 = vpop.f32.mrf.mxu0 }
  0xf0   :  { %v124_v34 = vmul.f32 14.285714, %v120_v33  ;;  %v222_v35 = vadd.f32 -0.3, %v120_v33  ;;  %v161_v37 = vsub.f32 0.5, %v120_v33 }
  0xf1   :  { %v276_v38 = vpop.f32.mrf.mxu0 }
  0xf2   :  { %v220_v39 = vadd.f32 -14.285714, %v124_v34  ;;  %v165_v40 = vmax.f32 %v222_v35, 0.0  ;;  %v162_v41 = vmax.f32 %v161_v37, 0.0 }
  0xf4   :  { %v173_v42 = vmul.f32 1.442695, %v220_v39  ;;  %v163_v43 = vadd.f32 1.0, %v162_v41  ;;  %v166_v44 = vmul.f32 1.4285715, %v165_v40 }
  0xf6   :  { %286 = vpow2.f32 %v173_v42  ;;  %v169_v45 = vsel %vm168_vm11, %v163_v43, 0.0  ;;  %v167_v46 = vadd.f32 1.0, %v166_v44 }
  0xf7   :  { %181 = vadd.xlane.f32.xlu0 %v169_v45  ;;  %v183_v52 = vmul.f32 %v220_v39, %v169_v45 }
  0xf8   :  { %v172_v47 = vsel %vm171_vm12, %v167_v46, 0.0 }
  0xf9   :  { %v194_v48 = vmul.f32 %v220_v39, %v172_v47 }
  0xfb   :  { %192 = vadd.xlane.f32.xlu0 %v172_v47  ;;  %v195_v49 = vmul.f32 %v194_v48, %v172_v47 }
  0xff   :  { %196 = vadd.xlane.f32.xlu0 %v195_v49 }
 0x103   :  { %v287_v50 = vpop.eup %286 }
 0x104   :  { %v175_v51 = vsel %vm397_vm8, %v287_v50, 0.0 }
 0x105   :  { %176 = vadd.xlane.f32.xlu1 %v175_v51 }
 0x109   :  { %184 = vadd.xlane.f32.xlu1 %v183_v52 }
 0x180   :  { %v182_v53 = vpop.xlane.xlu0 %181 }
 0x181   :  { %vm186_vm13 = vcmp.gt.f32.partialorder %v182_v53, 0.0 }
 0x182   :  { %v187_v55 = vsel %vm186_vm13, %v182_v53, 1.0  ;;  %v223_v6 = vsel %vm186_vm13, 1.0, %v319_v0 }
 0x183   :  { %288 = vrcp.f32 %v187_v55 }
 0x184   :  { %v193_v54 = vpop.xlane.xlu0 %192 }
 0x185   :  { %vm198_vm14 = vcmp.gt.f32.partialorder %v193_v54, 0.0 }
 0x186   :  { %v199_v56 = vsel %vm198_vm14, %v193_v54, 1.0  ;;  %v224_v8 = vsel %vm198_vm14, 1.0, %v319_v0 }
 0x187   :  { %290 = vrcp.f32 %v199_v56 }
 0x188   :  { %v197_v2 = vpop.xlane.xlu0 %196 }
 0x18e   :  { %v177_v57 = vpop.xlane.xlu1 %176 }
 0x18f   :  { %v178_v58 = vmax.f32 %v177_v57, 1e-30 }
 0x190   :  { %v289_v59 = vpop.eup %288 }
 0x191   :  { %292 = vlog2.f32 %v178_v58 }
 0x192   :  { %v185_v60 = vpop.xlane.xlu1 %184 }
 0x193   :  { %v189_v1 = vmul.f32 %v289_v59, %v185_v60 }
 0x194   :  { %v291_v61 = vpop.eup %290 }
 0x195   :  { %v201_v3 = vmul.f32 %v291_v61, %v197_v2 }
 0x197   :  { %v202_v7 = vsel %vm198_vm14, %v201_v3, 0.0 }
 0x19e   :  { %v293_v62 = vpop.eup %292 }
 0x19f   :  { %v180_v63 = vmul.f32 0.6931472, %v293_v62 }
 0x1a1   :  { %v190_v4 = vsub.f32 %v189_v1, %v180_v63 }
 0x1a3   :  { %v191_v5 = vsel %vm186_vm13, %v190_v4, 0.0 }
 0x1a4   :  { %204 = vst.msk [vmem:[%s433_s6] sm:$0xff] %vm203_vm15, %v191_v5 }
 0x1a5   :  { %208 = vst.msk [vmem:[%s433_s6] sm:$0xff] %vm207_vm0, %v223_v6 }
 0x1a6   :  { %210 = vst.msk [vmem:[%s433_s6] sm:$0xff] %vm209_vm1, %v202_v7 }
 0x1a7   :  { %214 = vst.msk [vmem:[%s433_s6] sm:$0xff] %vm213_vm2, %v224_v8 }
 0x1a8   :  { %219 = vsyncpa [#allocation3], 1 }

// kernel: tpu_custom_call.1
= control target key start
LH: loop header
LB: loop body
LE: loop exit
PB: predicated region body
PF: predicated region fallthrough
CT: control target
= control target key end

     0   :  { %11 = vsyncpa [#allocation3], 0  ;;  %s316_s21 = smov [#allocation2]   ;;  %s427_s0 = inlined_call_operand.vmem [shape: f32[8,128], index: 0, kind: input, shape index: {}]   ;;  %s428_s1 = inlined_call_operand.hbm [shape: f32[128,128], index: 1, kind: input, shape index: {}]   ;;  %s429_s2 = inlined_call_operand.vmem [shape: s32[8,1], index: 2, kind: input, shape index: {}]   ;;  %s430_s3 = inlined_call_operand.vmem [shape: s32[8,1], index: 3, kind: input, shape index: {}]   ;;  %s431_s4 = inlined_call_operand.vmem [shape: s32[1,128], index: 4, kind: input, shape index: {}]   ;;  %s432_s5 = inlined_call_operand.vmem [shape: s32[1,128], index: 5, kind: input, shape index: {}]   ;;  %s433_s6 = inlined_call_operand.vmem [shape: f32[8,4], index: 6, kind: output, shape index: {}]  }
   0x1   :  { %s19_s22 = sshll.u32 %s316_s21, 4  ;;  %s20_s22 = int_to_ptr.vmem [resolvable:$true] %s19_s22 }
   0x2   :  { %s302_s23 = scalar_lea.vmem %s20_s22, 2048  ;;  %p307_p1 = scmp.lt.s32.totalorder %s20_s22, %s20_s22 }
   0x3   :  { %p303_p0 = scmp.ne.s32.totalorder %s20_s22, %s302_s23  ;;  %p308_p2 = scmp.lt.s32.totalorder %s302_s23, %s302_s23 }
   0x5   :  { %p309_p3 = por %p308_p2, %p307_p1 }
   0x7   :  { %p310_p4 = pnand %p309_p3, %p303_p0 }
   0x9   :  { %313 = shalt.err (!%p310_p4)
}
   0xa   :  { %s317_s24 = smov 128   ;;  %s318_s25 = smov 8  }
   0xb   :  { %25 = dma.hbm_to_vmem [thread:$0]  %s428_s1, 2048, %s20_s22, [#allocation3], %s317_s24, %s317_s24, %s318_s25  }
   0xc   :  { %314 = dma.done.wait [#allocation3], 2048  }
   0xd   :  { %315 = vsyncadd [#allocation3], 4294965248  ;;  %v319_v0 = vmov 0.0   ;;  %vm320_vm0 = vmmov 0   ;;  %v321_v1 = vmov 0   ;;  %v53_v2 = vld [vmem:[#allocation2 + $0x78] sm:$0xff]  ;;  %v130_v22 = vlaneseq }
   0xe   :  { %242 = vmatprep.subr.mxu0 %v319_v0  ;;  %274 = vmatprep.mubr.msk.f32.mxu0 %vm320_vm0, %v319_v0  ;;  %v52_v3 = vld [vmem:[#allocation2 + $0x70] sm:$0xff]  ;;  %v51_v4 = vld [vmem:[#allocation2 + $0x68] sm:$0xff]  ;;  %v50_v5 = vld [vmem:[#allocation2 + $0x60] sm:$0xff]  ;;  %vm322_vm9 = vmmov 1   ;;  %vm203_vm15 = vcmask 7168   ;;  %vm207_vm0 = vcmask 15368  }
   0xf   :  { %284 = vset.pattern.permute.xlu0 %v321_v1  ;;  %285 = vset.pattern.permute.xlu1 %v321_v1  ;;  %v126_v6 = vld [vmem:[%s429_s2] sm:$0xff]  ;;  %v49_v7 = vld [vmem:[#allocation2 + $0x58] sm:$0xff]  ;;  %v48_v10 = vld [vmem:[#allocation2 + $0x50] sm:$0xff]  ;;  %v131_v24 = vshrl.u32 %v130_v22, 7 }
  0x10   :  { %243 = vmatpush3.msra.mxu0 %v53_v2  ;;  %135 = vperm.xlu0 %284, %v126_v6   ;;  %vm146_vm1 = vcmp.ge.s32.totalorder %v126_v6, 0  ;;  %v128_v8 = vld [vmem:[%s430_s3] sm:$0xff]  ;;  %v47_v11 = vld [vmem:[#allocation2 + $0x48] sm:$0xff]  ;;  %v45_v13 = vld [vmem:[#allocation2 + $0x38] sm:$0xff] }
  0x11   :  { %244 = vmatprep.subr.mxu0 %v319_v0  ;;  %v147_v9 = vsel %vm146_vm1, 1, %v321_v1  ;;  %154 = vperm.xlu1 %285, %v128_v8   ;;  %v46_v12 = vld [vmem:[#allocation2 + $0x40] sm:$0xff]  ;;  %v44_v14 = vld [vmem:[#allocation2 + $0x30] sm:$0xff]  ;;  %v43_v15 = vld [vmem:[#allocation2 + $0x28] sm:$0xff]  ;;  %v132_v25 = vsub.s32 0, %v131_v24  ;;  %vm209_vm1 = vcmask 23568  }
  0x12   :  { %245 = vmatpush3.msra.mxu0 %v52_v3  ;;  %v42_v16 = vld [vmem:[#allocation2 + $0x20] sm:$0xff]  ;;  %v41_v17 = vld [vmem:[#allocation2 + $0x18] sm:$0xff]  ;;  %v40_v18 = vld [vmem:[#allocation2 + $0x10] sm:$0xff] }
  0x13   :  { %246 = vmatprep.subr.mxu0 %v319_v0  ;;  %v39_v19 = vld [vmem:[#allocation2 + $0x8] sm:$0xff]  ;;  %v38_v20 = vld [vmem:[#allocation2] sm:$0xff] }
  0x14   :  { %247 = vmatpush3.msra.mxu0 %v51_v4  ;;  %149 = vperm.xlu0 %284, %v147_v9   ;;  %v37_v21 = vld [vmem:[%s427_s0] sm:$0xff] }
  0x15   :  { %248 = vmatprep.subr.mxu0 %v319_v0  ;;  %v127_v23 = vld [vmem:[%s431_s4] sm:$0x1] }
  0x16   :  { %249 = vmatpush3.msra.mxu0 %v50_v5  ;;  %vm138_vm2 = vcmp.ge.s32.totalorder %v127_v23, 0  ;;  %v133_v28 = vrot.slane %v127_v23, %v132_v25  ;;  %v221_v31 = vld [vmem:[%s432_s5] ss:$0 sm:$0xff] }
  0x17   :  { %250 = vmatprep.subr.mxu0 %v319_v0  ;;  %v139_v26 = vsel %vm138_vm2, 1, %v321_v1  ;;  %vm213_vm2 = vcmask 31768  }
  0x18   :  { %251 = vmatpush3.msra.mxu0 %v49_v7  ;;  %v143_v29 = vrot.slane %v139_v26, %v132_v25 }
  0x19   :  { %252 = vmatprep.subr.mxu0 %v319_v0 }
  0x1a   :  { %253 = vmatpush3.msra.mxu0 %v48_v10  ;;  %vm144_vm3 = vcmp.eq.s32.totalorder %v143_v29, 1 }
  0x1b   :  { %254 = vmatprep.subr.mxu0 %v319_v0 }
  0x1c   :  { %255 = vmatpush3.msra.mxu0 %v47_v11 }
  0x1d   :  { %256 = vmatprep.subr.mxu0 %v319_v0 }
  0x1e   :  { %257 = vmatpush3.msra.mxu0 %v46_v12 }
  0x1f   :  { %258 = vmatprep.subr.mxu0 %v319_v0 }
  0x20   :  { %259 = vmatpush3.msra.mxu0 %v45_v13 }
  0x21   :  { %260 = vmatprep.subr.mxu0 %v319_v0 }
  0x22   :  { %261 = vmatpush3.msra.mxu0 %v44_v14 }
  0x23   :  { %262 = vmatprep.subr.mxu0 %v319_v0 }
  0x24   :  { %263 = vmatpush3.msra.mxu0 %v43_v15 }
  0x25   :  { %264 = vmatprep.subr.mxu0 %v319_v0 }
  0x26   :  { %265 = vmatpush3.msra.mxu0 %v42_v16 }
  0x27   :  { %266 = vmatprep.subr.mxu0 %v319_v0 }
  0x28   :  { %267 = vmatpush3.msra.mxu0 %v41_v17 }
  0x29   :  { %268 = vmatprep.subr.mxu0 %v319_v0 }
  0x2a   :  { %269 = vmatpush3.msra.mxu0 %v40_v18 }
  0x2b   :  { %270 = vmatprep.subr.mxu0 %v319_v0 }
  0x2c   :  { %271 = vmatpush3.msra.mxu0 %v39_v19 }
  0x2d   :  { %272 = vmatprep.subr.mxu0 %v319_v0 }
  0x2e   :  { %273 = vmatpush3.msra.mxu0 %v38_v20 }
  0x2f   :  { %275 = vmatmul.mubr.f32.vlgmr.msra.gmra.mxu0 %v37_v21 }
  0x8b   :  { %v136_v27 = vpop.permute.xlu0 %135 }
  0x8c   :  { %vm137_vm4 = vcmp.ne.s32.totalorder %v133_v28, %v136_v27  ;;  %v155_v32 = vpop.permute.xlu1 %154 }
  0x8d   :  { %vm145_vm5 = vmand %vm137_vm4, %vm144_vm3  ;;  %vm160_vm7 = vcmp.eq.s32.totalorder %v155_v32, %v221_v31 }
  0x8e   :  { %vm170_vm10 = vmxor %vm160_vm7, %vm322_vm9 }
  0x8f   :  { %v150_v30 = vpop.permute.xlu0 %149 }
  0x90   :  { %vm151_vm6 = vcmp.eq.s32.totalorder %v150_v30, 1 }
  0x91   :  { %vm397_vm8 = vmand %vm145_vm5, %vm151_vm6 }
  0x92   :  { %vm168_vm11 = vmand %vm397_vm8, %vm160_vm7 }
  0x93   :  { %vm171_vm12 = vmand %vm397_vm8, %vm170_vm10 }
  0xef   :  { %v120_v33 = vpop.f32.mrf.mxu0 }
  0xf0   :  { %v124_v34 = vmul.f32 14.285714, %v120_v33  ;;  %v222_v35 = vadd.f32 -0.3, %v120_v33  ;;  %v161_v37 = vsub.f32 0.5, %v120_v33 }
  0xf1   :  { %v276_v38 = vpop.f32.mrf.mxu0 }
  0xf2   :  { %v220_v39 = vadd.f32 -14.285714, %v124_v34  ;;  %v165_v40 = vmax.f32 %v222_v35, 0.0  ;;  %v162_v41 = vmax.f32 %v161_v37, 0.0 }
  0xf4   :  { %v173_v42 = vmul.f32 1.442695, %v220_v39  ;;  %v163_v43 = vadd.f32 1.0, %v162_v41  ;;  %v166_v44 = vmul.f32 1.4285715, %v165_v40 }
  0xf6   :  { %286 = vpow2.f32 %v173_v42  ;;  %v169_v45 = vsel %vm168_vm11, %v163_v43, 0.0  ;;  %v167_v46 = vadd.f32 1.0, %v166_v44 }
  0xf7   :  { %181 = vadd.xlane.f32.xlu0 %v169_v45  ;;  %v183_v52 = vmul.f32 %v220_v39, %v169_v45 }
  0xf8   :  { %v172_v47 = vsel %vm171_vm12, %v167_v46, 0.0 }
  0xf9   :  { %v194_v48 = vmul.f32 %v220_v39, %v172_v47 }
  0xfb   :  { %192 = vadd.xlane.f32.xlu0 %v172_v47  ;;  %v195_v49 = vmul.f32 %v194_v48, %v172_v47 }
  0xff   :  { %196 = vadd.xlane.f32.xlu0 %v195_v49 }
 0x103   :  { %v287_v50 = vpop.eup %286 }
 0x104   :  { %v175_v51 = vsel %vm397_vm8, %v287_v50, 0.0 }
 0x105   :  { %176 = vadd.xlane.f32.xlu1 %v175_v51 }
 0x109   :  { %184 = vadd.xlane.f32.xlu1 %v183_v52 }
 0x180   :  { %v182_v53 = vpop.xlane.xlu0 %181 }
 0x181   :  { %vm186_vm13 = vcmp.gt.f32.partialorder %v182_v53, 0.0 }
 0x182   :  { %v187_v55 = vsel %vm186_vm13, %v182_v53, 1.0  ;;  %v223_v6 = vsel %vm186_vm13, 1.0, %v319_v0 }
 0x183   :  { %288 = vrcp.f32 %v187_v55 }
 0x184   :  { %v193_v54 = vpop.xlane.xlu0 %192 }
 0x185   :  { %vm198_vm14 = vcmp.gt.f32.partialorder %v193_v54, 0.0 }
 0x186   :  { %v199_v56 = vsel %vm198_vm14, %v193_v54, 1.0  ;;  %v224_v8 = vsel %vm198_vm14, 1.0, %v319_v0 }
 0x187   :  { %290 = vrcp.f32 %v199_v56 }
 0x188   :  { %v197_v2 = vpop.xlane.xlu0 %196 }
 0x18e   :  { %v177_v57 = vpop.xlane.xlu1 %176 }
 0x18f   :  { %v178_v58 = vmax.f32 %v177_v57, 1e-30 }
 0x190   :  { %v289_v59 = vpop.eup %288 }
 0x191   :  { %292 = vlog2.f32 %v178_v58 }
 0x192   :  { %v185_v60 = vpop.xlane.xlu1 %184 }
 0x193   :  { %v189_v1 = vmul.f32 %v289_v59, %v185_v60 }
 0x194   :  { %v291_v61 = vpop.eup %290 }
 0x195   :  { %v201_v3 = vmul.f32 %v291_v61, %v197_v2 }
 0x197   :  { %v202_v7 = vsel %vm198_vm14, %v201_v3, 0.0 }
 0x19e   :  { %v293_v62 = vpop.eup %292 }
 0x19f   :  { %v180_v63 = vmul.f32 0.6931472, %v293_v62 }
 0x1a1   :  { %v190_v4 = vsub.f32 %v189_v1, %v180_v63 }
 0x1a3   :  { %v191_v5 = vsel %vm186_vm13, %v190_v4, 0.0 }
 0x1a4   :  { %204 = vst.msk [vmem:[%s433_s6] sm:$0xff] %vm203_vm15, %v191_v5 }
 0x1a5   :  { %208 = vst.msk [vmem:[%s433_s6] sm:$0xff] %vm207_vm0, %v223_v6 }
 0x1a6   :  { %210 = vst.msk [vmem:[%s433_s6] sm:$0xff] %vm209_vm1, %v202_v7 }
 0x1a7   :  { %214 = vst.msk [vmem:[%s433_s6] sm:$0xff] %vm213_vm2, %v224_v8 }
 0x1a8   :  { %219 = vsyncpa [#allocation3], 1 }

</bundles_post_ra>
